<compile_context>
chip_gen: v6e
topology: v6e:2x2x1
jax: 0.10.0
libtpu: 0.0.40
codegen_flags: <defaults>
</compile_context>

<pallas_src>
import functools
import re

import jax
import jax.numpy as jnp
import numpy as np
from jax.experimental import pallas as pl
from jax.experimental.pallas import tpu as pltpu

_MiB = 1 << 20
_LANE_CANDIDATES = (8192, 4096, 2048, 1024, 512, 256, 128)


def _cdiv(a, b):
    return -(-a // b)


def _tpu_generation():
    """Best-effort TPU generation from device_kind ('TPU v5e' -> 5, 'TPU7x' -> 7)."""
    try:
        kind = jax.devices()[0].device_kind
        m = re.search(r"(\d+)", kind)
        if m:
            return int(m.group(1))
    except Exception:
        pass
    return 6  # conservative default


def _choose_cols(total):
    """Widest lane-dense column count that divides the element count (or None)."""
    for c in _LANE_CANDIDATES:
        if total % c == 0:
            return c
    return None


# ----------------------------------------------------------------------------
# Kernel: out = x * relu6(x + 3) / 6   (h_swish), elementwise on one tile.
#   x_ref, o_ref : (tile_rows, cols)   with cols a multiple of 128 (lane-dense)
# ----------------------------------------------------------------------------
def _h_swish_kernel(x_ref, o_ref, *, compute_f32):
    x = x_ref[...]
    if compute_f32:
        x = x.astype(jnp.float32)
    y = x * (jnp.clip(x + 3.0, 0.0, 6.0) * (1.0 / 6.0))
    o_ref[...] = y.astype(o_ref.dtype)


def _h_swish_jnp(x):
    """Tiny-tail / fallback path in plain jnp (same math, f32 accumulation)."""
    xf = x.astype(jnp.float32)
    return (xf * jnp.clip(xf + 3.0, 0.0, 6.0) * (1.0 / 6.0)).astype(x.dtype)


def _h_swish_2d(x2, *, target_tile_bytes=None):
    """Run the Pallas kernel on a lane-dense (rows, cols) view, cols % 128 == 0."""
    rows, cols = x2.shape
    dtype = x2.dtype
    elt = jnp.dtype(dtype).itemsize
    gen = _tpu_generation()

    if target_tile_bytes is None:
        if gen >= 7:
            target_tile_bytes = 8 * _MiB   # amortize per-step cost vs 3.2 TB/s HBM
        elif gen == 6:
            target_tile_bytes = 4 * _MiB
        else:
            target_tile_bytes = 2 * _MiB   # v5e: already at roofline, keep VMEM low

    # dtype-aware sublane alignment: 8 x packing factor (f32:8, bf16:16, int8:32).
    packing = max(1, 4 // elt)
    sub = 8 * packing

    bytes_total = rows * cols * elt
    want_tiles = max(1, _cdiv(bytes_total, target_tile_bytes))
    if gen >= 7 and rows >= 2 * sub:
        # v7x has 2 TensorCores: make the parallel axis >= 2 steps and even.
        want_tiles = max(2, want_tiles)
        if want_tiles % 2:
            want_tiles += 1

    tile_rows = _cdiv(rows, want_tiles)
    tile_rows = max(sub, _cdiv(tile_rows, sub) * sub)
    tile_rows = min(tile_rows, rows)          # block == full extent if rows is small
    num_tiles = _cdiv(rows, tile_rows)

    # Double-buffered input + output tiles of the *storage* dtype, plus headroom.
    tile_bytes = tile_rows * cols * elt
    vmem_limit = int(min(max(4 * tile_bytes + (1 << 20), 4 << 20), 100 << 20))

    # bf16 VPU exists on v6e/v7x: compute natively there; f32 elsewhere.
    compute_f32 = not (dtype == jnp.bfloat16 and gen >= 6)

    kernel = functools.partial(_h_swish_kernel, compute_f32=compute_f32)
    cost = pl.CostEstimate(
        flops=5 * rows * cols,
        transcendentals=0,
        bytes_accessed=2 * rows * cols * elt,
    )

    return pl.pallas_call(
        kernel,
        out_shape=jax.ShapeDtypeStruct((rows, cols), dtype),
        grid=(num_tiles,),
        in_specs=[pl.BlockSpec((tile_rows, cols), lambda i: (i, 0))],
        out_specs=pl.BlockSpec((tile_rows, cols), lambda i: (i, 0)),
        compiler_params=pltpu.CompilerParams(
            dimension_semantics=("parallel",),
            vmem_limit_bytes=vmem_limit),
        cost_estimate=cost,
    )(x2)


def h_swish(x):
    """h_swish forward: x * relu6(x + 3) / 6, any shape / float dtype."""
    orig_shape = x.shape
    total = x.size
    if total == 0:
        return x

    cols = _choose_cols(total)
    if cols is not None:
        y2 = _h_swish_2d(x.reshape(total // cols, cols))
        return y2.reshape(orig_shape)

    # Element count not a multiple of 128: kernel on the divisible prefix,
    # plain jnp on the (<128-element) tail.  No full-array pad/copy.
    main = (total // 128) * 128
    xf = x.reshape(-1)
    if main == 0:
        return _h_swish_jnp(xf).reshape(orig_shape)
    main_cols = _choose_cols(main)
    y_main = _h_swish_2d(xf[:main].reshape(main // main_cols, main_cols)).reshape(-1)
    y_tail = _h_swish_jnp(xf[main:])
    return jnp.concatenate([y_main, y_tail]).reshape(orig_shape)


# ----------------------------------------------------------------------------
# Pure-JAX reference (same math) for a sanity check.
# ----------------------------------------------------------------------------
def h_swish_ref(x):
    xf = x.astype(jnp.float32)
    return (xf * jnp.clip(xf + 3.0, 0.0, 6.0) / 6.0).astype(x.dtype)


if __name__ == "__main__":
    key = jax.random.PRNGKey(0)
    fn = jax.jit(h_swish)

    # Main shape implied by the conv module: (N, C, H, W) = (2, 4, 16, 16).
    x = jax.random.normal(key, (2, 4, 16, 16), jnp.float32) * 4.0  # exercise both clips
    out = jax.block_until_ready(fn(x))
    assert out.shape == x.shape, out.shape
    np.testing.assert_allclose(np.asarray(out), np.asarray(h_swish_ref(x)),
                               rtol=1e-6, atol=1e-6)

    # Non-multiple-of-128 element count: exercises the prefix + jnp-tail path.
    x2 = jax.random.normal(jax.random.PRNGKey(1), (2, 25, 41), jnp.float32) * 4.0
    out2 = jax.block_until_ready(fn(x2))
    assert out2.shape == x2.shape, out2.shape
    np.testing.assert_allclose(np.asarray(out2), np.asarray(h_swish_ref(x2)),
                               rtol=1e-6, atol=1e-6)

    print("KERNEL_OK")
</pallas_src>

<mosaic_0001>
module attributes {stable_mosaic.version = 11 : i64} {
  func.func @_h_swish_kernel(%arg0: i32, %arg1: memref<1x2048xf32, #tpu.memory_space<vmem>>, %arg2: memref<1x2048xf32, #tpu.memory_space<vmem>>) attributes {dimension_semantics = [#tpu.dimension_semantics<parallel>], iteration_bounds = array<i64: 1>, scalar_prefetch = 0 : i64, scratch_operands = 0 : i64, tpu.core_type = #tpu.core_type<tc>, window_params = [{transform_indices = @transform_0, window_bounds = array<i64: 1, 2048>}, {transform_indices = @transform_1, window_bounds = array<i64: 1, 2048>}]} {
    %c0 = arith.constant 0 : index
    %c0_0 = arith.constant 0 : index
    %0 = vector.load %arg1[%c0, %c0_0] : memref<1x2048xf32, #tpu.memory_space<vmem>>, vector<1x2048xf32>
    %cst = arith.constant 3.000000e+00 : f32
    %1 = vector.broadcast %cst : f32 to vector<1x2048xf32>
    %2 = arith.addf %0, %1 : vector<1x2048xf32>
    %cst_1 = arith.constant 0.000000e+00 : f32
    %cst_2 = arith.constant 6.000000e+00 : f32
    %3 = vector.broadcast %cst_1 : f32 to vector<1x2048xf32>
    %4 = arith.maximumf %3, %2 : vector<1x2048xf32>
    %5 = vector.broadcast %cst_2 : f32 to vector<1x2048xf32>
    %6 = arith.minimumf %5, %4 : vector<1x2048xf32>
    %cst_3 = arith.constant 0.166666672 : f32
    %7 = vector.broadcast %cst_3 : f32 to vector<1x2048xf32>
    %8 = arith.mulf %6, %7 : vector<1x2048xf32>
    %9 = arith.mulf %0, %8 : vector<1x2048xf32>
    %c0_4 = arith.constant 0 : index
    %c0_5 = arith.constant 0 : index
    %10 = vector.load %arg2[%c0_4, %c0_5] : memref<1x2048xf32, #tpu.memory_space<vmem>>, vector<1x2048xf32>
    tpu.vector_store %arg2[%c0_4, %c0_5], %9 {strides = array<i32>} : memref<1x2048xf32, #tpu.memory_space<vmem>>, vector<1x2048xf32>,
    return
  }
  func.func @transform_0(%arg0: i32) -> (i32, i32) {
    %c0_i32 = arith.constant 0 : i32
    %c0_i32_0 = arith.constant 0 : i32
    return %arg0, %c0_i32 : i32, i32
  }
  func.func @transform_1(%arg0: i32) -> (i32, i32) {
    %c0_i32 = arith.constant 0 : i32
    %c0_i32_0 = arith.constant 0 : i32
    return %arg0, %c0_i32 : i32, i32
  }
}

</mosaic_0001>

<bundles_post_ra>
// kernel: h_swish.1
= control target key start
LH: loop header
LB: loop body
LE: loop exit
PB: predicated region body
PF: predicated region fallthrough
CT: control target
= control target key end

     0   :  { %s48_s0 = inlined_call_operand.vmem [shape: f32[1,2048], index: 0, kind: input, shape index: {}]   ;;  %s49_s1 = inlined_call_operand.vmem [shape: f32[1,2048], index: 1, kind: output, shape index: {}]  }
   0x1   :  { %v8_v0 = vld [vmem:[%s48_s0] sm:$0xff]  ;;  %v9_v1 = vld [vmem:[%s48_s0 + $0x8] sm:$0xff] }
   0x2   :  { %v10_v2 = vadd.f32 3.0, %v8_v0  ;;  %v11_v3 = vadd.f32 3.0, %v9_v1 }
   0x4   :  { %v12_v4 = vmax.f32 %v10_v2, 0.0  ;;  %v13_v5 = vmax.f32 %v11_v3, 0.0 }
   0x6   :  { %v14_v6 = vmin.f32 %v12_v4, 6.0  ;;  %v15_v7 = vmin.f32 %v13_v5, 6.0 }
   0x8   :  { %v16_v8 = vmul.f32 0.16666667, %v14_v6  ;;  %v17_v9 = vmul.f32 0.16666667, %v15_v7 }
   0xa   :  { %v18_v10 = vmul.f32 %v16_v8, %v8_v0  ;;  %v19_v11 = vmul.f32 %v17_v9, %v9_v1 }
   0xc   :  { %20 = vst [vmem:[%s49_s1] sm:$0xff] %v18_v10  ;;  %21 = vst [vmem:[%s49_s1 + $0x8] sm:$0xff] %v19_v11 }

</bundles_post_ra>
